<compile_context>
chip_gen: v7x
topology: tpu7x:2x2x1
jax: 0.10.0
libtpu: 0.0.40
codegen_flags: <defaults>
</compile_context>

<pallas_src>
import functools

import jax
import jax.numpy as jnp
from jax.experimental import pallas as pl
from jax.experimental.pallas import tpu as pltpu


# --------------------------------------------------------------------- HW info / budgets
@functools.lru_cache(maxsize=1)
def _vmem_capacity_bytes():
    try:
        cap = getattr(pltpu.get_tpu_info(), "vmem_capacity_bytes", None)
        if cap:
            return int(cap)
    except Exception:
        pass
    return 64 << 20  # conservative default (v7x per-TensorCore VMEM)


def _budgets():
    cap = _vmem_capacity_bytes()
    # Hard cap handed to Mosaic: leave headroom for internal scratch / semaphores.
    limit_cap = max(cap - ((12 << 20) if cap <= (80 << 20) else (18 << 20)), 32 << 20)
    # Fused-path residency threshold: ~40 MiB on 64-MiB parts, ~100 MiB on 128-MiB parts.
    fused_budget = min(cap - (24 << 20), 100 << 20)
    # Per-stream tile target for the tiled fallback.
    tile_target = (4 << 20) if cap <= (80 << 20) else (8 << 20)
    return fused_budget, limit_cap, tile_target


def _vmem_limit(resident_bytes, limit_cap):
    return int(min(max(resident_bytes + (8 << 20), 16 << 20), limit_cap))


# --------------------------------------------------------------------------- gate MLP
def _channel_gate(p1, p2, w1at, w1bt, b1row, w2k, b2col):
    """Pooled means (Cf,1) -> channel gate z (Cf,1).  Pure VPU/XLU (no matvec)."""
    # conv1 (1x1) on concat(p1, p2) + ReLU:   y = W1a @ p1 + W1b @ p2 + b1
    y = jnp.sum(w1at * p1 + w1bt * p2, axis=0, keepdims=True) + b1row   # (1, C)
    y = jnp.maximum(y, 0.0)
    # conv2 (1x1) + sigmoid (rows already replicated k times via pre-folded weights).
    z = jnp.sum(w2k * y, axis=-1, keepdims=True) + b2col                # (Cf, 1)
    return 1.0 / (1.0 + jnp.exp(-z))


# ----------------------------------------------------------------------------- fused
def cab_fused_kernel(x1_ref, x2_ref, w1at_ref, w1bt_ref, b1_ref, w2k_ref, b2_ref,
                     o_ref, *, inv_hw):
    # Block shapes: x1/x2/o (1, Cf, HWf); w1at/w1bt/w2k (Cf, C); b1 (1, C); b2 (Cf, 1)
    x1 = x1_ref[0].astype(jnp.float32)                    # (Cf, HWf)
    x2 = x2_ref[0].astype(jnp.float32)
    # Global average pooling over the lane (spatial) axis; inv_hw = 1/(H*W) (unfolded).
    p1 = jnp.sum(x1, axis=-1, keepdims=True) * inv_hw     # (Cf, 1)
    p2 = jnp.sum(x2, axis=-1, keepdims=True) * inv_hw
    z = _channel_gate(p1, p2, w1at_ref[...], w1bt_ref[...], b1_ref[...],
                      w2k_ref[...], b2_ref[...])          # (Cf, 1)
    o_ref[0] = (z * x2 + x1).astype(o_ref.dtype)


def _fused_call(x1f, x2f, w1at, w1bt, b1row, w2k, b2col, *, inv_hw,
                resident_bytes, limit_cap):
    B, Cf, HWf = x1f.shape
    io_bytes = x1f.dtype.itemsize
    full = lambda b: (0, 0)
    cost = pl.CostEstimate(flops=int(6 * B * Cf * HWf),
                           transcendentals=int(B * Cf),
                           bytes_accessed=int(3 * B * Cf * HWf * io_bytes))
    # TODO(synk): for B == 1 the batch-grid cannot pipeline; a pl.Buffered(1) /
    # emit_pipeline HW-chunked fused variant would halve VMEM residency there.
    return pl.pallas_call(
        functools.partial(cab_fused_kernel, inv_hw=inv_hw),
        out_shape=jax.ShapeDtypeStruct((B, Cf, HWf), x1f.dtype),
        grid_spec=pltpu.PrefetchScalarGridSpec(
            num_scalar_prefetch=0,
            grid=(B,),
            in_specs=[
                pl.BlockSpec((1, Cf, HWf), lambda b: (b, 0, 0)),   # x1
                pl.BlockSpec((1, Cf, HWf), lambda b: (b, 0, 0)),   # x2
                pl.BlockSpec(w1at.shape, full),
                pl.BlockSpec(w1bt.shape, full),
                pl.BlockSpec(b1row.shape, full),
                pl.BlockSpec(w2k.shape, full),
                pl.BlockSpec(b2col.shape, full),
            ],
            out_specs=pl.BlockSpec((1, Cf, HWf), lambda b: (b, 0, 0)),
        ),
        compiler_params=pltpu.CompilerParams(
            dimension_semantics=("parallel",),
            vmem_limit_bytes=_vmem_limit(resident_bytes, limit_cap),
        ),
        cost_estimate=cost,
    )(x1f, x2f, w1at, w1bt, b1row, w2k, b2col)


# ----------------------------------------------------------------------------- tiled
def cab_pool_kernel(x1_ref, x2_ref, w1at_ref, w1bt_ref, b1_ref, w2k_ref, b2_ref,
                    z_ref, s1_ref, s2_ref, *, inv_hw, hw_valid, tile_hw, needs_mask):
    # Pass 1: accumulate pooled sums across HW tiles; on the last tile run the gate MLP.
    t = pl.program_id(1)
    last = pl.num_programs(1) - 1

    @pl.when(t == 0)
    def _():
        s1_ref[...] = jnp.zeros_like(s1_ref)
        s2_ref[...] = jnp.zeros_like(s2_ref)

    x1 = x1_ref[0].astype(jnp.float32)                    # (Cf, tile_hw)
    x2 = x2_ref[0].astype(jnp.float32)

    if needs_mask:  # static: only the final (partial) tile needs lane masking
        @pl.when(t != last)
        def _():
            s1_ref[...] += jnp.sum(x1, axis=-1, keepdims=True)
            s2_ref[...] += jnp.sum(x2, axis=-1, keepdims=True)

        @pl.when(t == last)
        def _():
            col = t * tile_hw + jax.lax.broadcasted_iota(jnp.int32, x1.shape, 1)
            valid = col < hw_valid
            s1_ref[...] += jnp.sum(jnp.where(valid, x1, 0.0), axis=-1, keepdims=True)
            s2_ref[...] += jnp.sum(jnp.where(valid, x2, 0.0), axis=-1, keepdims=True)
    else:
        s1_ref[...] += jnp.sum(x1, axis=-1, keepdims=True)
        s2_ref[...] += jnp.sum(x2, axis=-1, keepdims=True)

    @pl.when(t == last)
    def _():
        z_ref[0] = _channel_gate(s1_ref[...] * inv_hw, s2_ref[...] * inv_hw,
                                 w1at_ref[...], w1bt_ref[...], b1_ref[...],
                                 w2k_ref[...], b2_ref[...])


def cab_apply_kernel(z_ref, x1_ref, x2_ref, o_ref):
    # Pass 2: per-channel scale + residual, purely elementwise per HW tile.
    x1 = x1_ref[0].astype(jnp.float32)
    x2 = x2_ref[0].astype(jnp.float32)
    o_ref[0] = (z_ref[0] * x2 + x1).astype(o_ref.dtype)


def _tiled_call(x1f, x2f, w1at, w1bt, b1row, w2k, b2col, *, inv_hw, tile_hw,
                c_pad, limit_cap, use_xla_gate):
    B, Cf, HWf = x1f.shape
    io_bytes = x1f.dtype.itemsize
    n_hw = pl.cdiv(HWf, tile_hw)
    needs_mask = (HWf % tile_hw) != 0
    tile_io = c_pad * tile_hw * io_bytes
    tile_f32 = c_pad * tile_hw * 4

    if use_xla_gate:
        # B == 1: a single-batch Pallas reduction would run on one TensorCore only.
        # Compute GAP + tiny MLP with plain XLA (same HBM traffic, megacore-friendly)
        # and keep only the bandwidth-heavy apply pass in Pallas.
        s1 = jnp.sum(x1f.astype(jnp.float32), axis=-1)               # (B, Cf)
        s2 = jnp.sum(x2f.astype(jnp.float32), axis=-1)
        y = (s1 * inv_hw) @ w1at + (s2 * inv_hw) @ w1bt + b1row      # (B, C)
        y = jnp.maximum(y, 0.0)
        zlin = y @ w2k.T + b2col.reshape(1, -1)                      # (B, Cf)
        z = (1.0 / (1.0 + jnp.exp(-zlin))).reshape(B, Cf, 1)
    else:
        pool_cost = pl.CostEstimate(flops=int(2 * B * Cf * HWf),
                                    transcendentals=int(B * Cf),
                                    bytes_accessed=int(2 * B * Cf * HWf * io_bytes))
        wmap = lambda b, t: (0, 0)
        z = pl.pallas_call(
            functools.partial(cab_pool_kernel, inv_hw=inv_hw, hw_valid=HWf,
                              tile_hw=tile_hw, needs_mask=needs_mask),
            out_shape=jax.ShapeDtypeStruct((B, Cf, 1), jnp.float32),
            grid_spec=pltpu.PrefetchScalarGridSpec(
                num_scalar_prefetch=0,
                grid=(B, n_hw),
                in_specs=[
                    pl.BlockSpec((1, Cf, tile_hw), lambda b, t: (b, 0, t)),   # x1
                    pl.BlockSpec((1, Cf, tile_hw), lambda b, t: (b, 0, t)),   # x2
                    pl.BlockSpec(w1at.shape, wmap),
                    pl.BlockSpec(w1bt.shape, wmap),
                    pl.BlockSpec(b1row.shape, wmap),
                    pl.BlockSpec(w2k.shape, wmap),
                    pl.BlockSpec(b2col.shape, wmap),
                ],
                out_specs=pl.BlockSpec((1, Cf, 1), lambda b, t: (b, 0, 0)),
                scratch_shapes=[pltpu.VMEM((Cf, 1), jnp.float32),
                                pltpu.VMEM((Cf, 1), jnp.float32)],
            ),
            compiler_params=pltpu.CompilerParams(
                dimension_semantics=("parallel", "arbitrary"),
                vmem_limit_bytes=_vmem_limit(4 * tile_io + 4 * tile_f32, limit_cap),
            ),
            cost_estimate=pool_cost,
        )(x1f, x2f, w1at, w1bt, b1row, w2k, b2col)

    apply_cost = pl.CostEstimate(flops=int(2 * B * Cf * HWf),
                                 transcendentals=0,
                                 bytes_accessed=int(3 * B * Cf * HWf * io_bytes))
    out = pl.pallas_call(
        cab_apply_kernel,
        out_shape=jax.ShapeDtypeStruct((B, Cf, HWf), x1f.dtype),
        grid_spec=pltpu.PrefetchScalarGridSpec(
            num_scalar_prefetch=0,
            grid=(B, n_hw),
            in_specs=[
                pl.BlockSpec((1, Cf, 1), lambda b, t: (b, 0, 0)),             # z
                pl.BlockSpec((1, Cf, tile_hw), lambda b, t: (b, 0, t)),       # x1
                pl.BlockSpec((1, Cf, tile_hw), lambda b, t: (b, 0, t)),       # x2
            ],
            out_specs=pl.BlockSpec((1, Cf, tile_hw), lambda b, t: (b, 0, t)),
        ),
        compiler_params=pltpu.CompilerParams(
            dimension_semantics=("parallel", "parallel"),
            vmem_limit_bytes=_vmem_limit(8 * tile_io + 3 * tile_f32, limit_cap),
        ),
        cost_estimate=apply_cost,
    )(z, x1f, x2f)
    return out


# --------------------------------------------------------------------------- wrapper
def _fold_factor(C, HW):
    """Fold spatial into sublanes when C < 8 so the (8,128) vreg is not mostly padding."""
    if C >= 8:
        return 1
    k = max(1, 8 // C)
    while k > 1 and HW % k != 0:
        k -= 1
    return k


def cab_forward(x1, x2, w1, b1, w2, b2, *, force_tile_hw=None):
    """x1, x2: (B, C, H, W) NCHW (f32 or bf16); w1: (C, 2C); b1: (C,); w2: (C, C); b2: (C,)."""
    B, C, H, W = x1.shape
    Cout = w1.shape[0]
    assert x2.shape == x1.shape and x2.dtype == x1.dtype
    assert w1.shape == (Cout, 2 * C) and Cout == C
    HW = H * W
    inv_hw = 1.0 / float(HW)

    k = _fold_factor(C, HW)
    Cf, HWf = C * k, HW // k

    # NCHW -> (B, Cf, HWf): contiguous reshape (free); spatial lands on lanes.
    x1f = x1.reshape(B, Cf, HWf)
    x2f = x2.reshape(B, Cf, HWf)

    # Pre-fold the 1x1-conv weights (wrapper-side, tiny) so the in-kernel MLP is pure
    # broadcast-multiply + reductions and already emits z replicated k times per channel.
    f32 = jnp.float32
    w1at = jnp.repeat(w1[:, :C], k, axis=1).T.astype(f32)       # (Cf, C) acts on pooled x1
    w1bt = jnp.repeat(w1[:, C:], k, axis=1).T.astype(f32)       # (Cf, C) acts on pooled x2
    b1row = b1.reshape(1, C).astype(f32)                        # (1, C)
    w2k = jnp.repeat(w2, k, axis=0).astype(f32)                 # (Cf, C)
    b2col = jnp.repeat(b2, k, axis=0).reshape(Cf, 1).astype(f32)

    fused_budget, limit_cap, tile_target = _budgets()

    io_bytes = x1.dtype.itemsize
    c_pad = ((Cf + 7) // 8) * 8
    hw_pad = ((HWf + 127) // 128) * 128
    block_io = c_pad * hw_pad * io_bytes
    block_f32 = c_pad * hw_pad * 4
    # 3 double-buffered I/O streams + ~3 full-block f32 temporaries for the upcast math.
    fused_resident = 6 * block_io + 3 * block_f32

    if force_tile_hw is None and fused_resident <= fused_budget:
        outf = _fused_call(x1f, x2f, w1at, w1bt, b1row, w2k, b2col,
                           inv_hw=inv_hw, resident_bytes=fused_resident,
                           limit_cap=limit_cap)
    else:
        if force_tile_hw is not None:
            tile_hw = max(128, (int(force_tile_hw) // 128) * 128)
        else:
            tile_hw = max(128, (tile_target // (c_pad * io_bytes)) // 128 * 128)
        if tile_hw >= HWf:
            tile_hw = HWf
        outf = _tiled_call(x1f, x2f, w1at, w1bt, b1row, w2k, b2col,
                           inv_hw=inv_hw, tile_hw=tile_hw, c_pad=c_pad,
                           limit_cap=limit_cap, use_xla_gate=(B == 1))

    # (B, Cf, HWf) -> NCHW: free reshape.
    return outf.reshape(B, C, H, W)


def cab_reference(x1, x2, w1, b1, w2, b2):
    """Pure-JAX reference mirroring the PyTorch forward."""
    x = jnp.concatenate([x1, x2], axis=1)
    p = jnp.mean(x, axis=(2, 3), keepdims=True)                       # (B, 2C, 1, 1)
    y = jnp.einsum("oc,bcij->boij", w1, p) + b1[None, :, None, None]
    y = jnp.maximum(y, 0.0)
    z = jnp.einsum("oc,bcij->boij", w2, y) + b2[None, :, None, None]
    z = 1.0 / (1.0 + jnp.exp(-z))
    return z * x2 + x1


if __name__ == "__main__":
    key = jax.random.PRNGKey(0)
    k_x1, k_x2, k_w1, k_b1, k_w2, k_b2 = jax.random.split(key, 6)

    B, C = 2, 4
    Cin, Cout = 2 * C, C
    k1 = 1.0 / (Cin ** 0.5)
    w1 = jax.random.uniform(k_w1, (Cout, Cin), jnp.float32, -k1, k1)
    b1 = jax.random.uniform(k_b1, (Cout,), jnp.float32, -k1, k1)
    k2 = 1.0 / (Cout ** 0.5)
    w2 = jax.random.uniform(k_w2, (Cout, Cout), jnp.float32, -k2, k2)
    b2 = jax.random.uniform(k_b2, (Cout,), jnp.float32, -k2, k2)

    # 1) Fused path, f32 I/O, 16x16.
    x1 = jax.random.normal(k_x1, (B, C, 16, 16), jnp.float32)
    x2 = jax.random.normal(k_x2, (B, C, 16, 16), jnp.float32)
    ref = cab_reference(x1, x2, w1, b1, w2, b2)
    out = jax.block_until_ready(cab_forward(x1, x2, w1, b1, w2, b2))
    assert out.shape == (B, C, 16, 16)
    assert jnp.allclose(out, ref, atol=1e-5, rtol=1e-5), "fused f32 mismatch vs reference"

    # 2) Fused path, bf16 streaming (f32 compute in-kernel).
    x1h, x2h = x1.astype(jnp.bfloat16), x2.astype(jnp.bfloat16)
    ref_h = cab_reference(x1h.astype(jnp.float32), x2h.astype(jnp.float32), w1, b1, w2, b2)
    out_h = jax.block_until_ready(cab_forward(x1h, x2h, w1, b1, w2, b2))
    assert out_h.dtype == jnp.bfloat16
    assert jnp.allclose(out_h.astype(jnp.float32), ref_h, atol=5e-2, rtol=5e-2), \
        "fused bf16 mismatch vs reference"

    # 3) Tiled two-pass fallback with a partial (masked) last HW tile.
    x1b = jax.random.normal(k_x1, (B, C, 20, 20), jnp.float32)
    x2b = jax.random.normal(k_x2, (B, C, 20, 20), jnp.float32)
    ref_b = cab_reference(x1b, x2b, w1, b1, w2, b2)
    out_b = jax.block_until_ready(cab_forward(x1b, x2b, w1, b1, w2, b2, force_tile_hw=128))
    assert jnp.allclose(out_b, ref_b, atol=1e-5, rtol=1e-5), "tiled f32 mismatch vs reference"

    # 4) B == 1 tiled path: XLA computes the channel gate, Pallas applies it.
    x1c, x2c = x1b[:1], x2b[:1]
    ref_c = cab_reference(x1c, x2c, w1, b1, w2, b2)
    out_c = jax.block_until_ready(cab_forward(x1c, x2c, w1, b1, w2, b2, force_tile_hw=128))
    assert jnp.allclose(out_c, ref_c, atol=1e-5, rtol=1e-5), "B=1 tiled mismatch vs reference"

    print("KERNEL_OK")
</pallas_src>

<mosaic_0001>
module attributes {stable_mosaic.version = 11 : i64} {
  func.func @cab_fused_kernel(%arg0: i32, %arg1: memref<1x8x128xf32, #tpu.memory_space<vmem>>, %arg2: memref<1x8x128xf32, #tpu.memory_space<vmem>>, %arg3: memref<8x4xf32, #tpu.memory_space<vmem>>, %arg4: memref<8x4xf32, #tpu.memory_space<vmem>>, %arg5: memref<1x4xf32, #tpu.memory_space<vmem>>, %arg6: memref<8x4xf32, #tpu.memory_space<vmem>>, %arg7: memref<8x1xf32, #tpu.memory_space<vmem>>, %arg8: memref<1x8x128xf32, #tpu.memory_space<vmem>>) attributes {dimension_semantics = [#tpu.dimension_semantics<parallel>], iteration_bounds = array<i64: 2>, scalar_prefetch = 0 : i64, scratch_operands = 0 : i64, tpu.core_type = #tpu.core_type<tc>, window_params = [{transform_indices = @transform_0, window_bounds = array<i64: 1, 8, 128>}, {transform_indices = @transform_1, window_bounds = array<i64: 1, 8, 128>}, {pipeline_mode = #tpu.pipeline_mode<synchronous>, transform_indices = @transform_2, window_bounds = array<i64: 8, 4>}, {pipeline_mode = #tpu.pipeline_mode<synchronous>, transform_indices = @transform_3, window_bounds = array<i64: 8, 4>}, {pipeline_mode = #tpu.pipeline_mode<synchronous>, transform_indices = @transform_4, window_bounds = array<i64: 1, 4>}, {pipeline_mode = #tpu.pipeline_mode<synchronous>, transform_indices = @transform_5, window_bounds = array<i64: 8, 4>}, {pipeline_mode = #tpu.pipeline_mode<synchronous>, transform_indices = @transform_6, window_bounds = array<i64: 8, 1>}, {transform_indices = @transform_7, window_bounds = array<i64: 1, 8, 128>}]} {
    %c0 = arith.constant 0 : index
    %c0_0 = arith.constant 0 : index
    %c0_1 = arith.constant 0 : index
    %0 = vector.load %arg1[%c0, %c0_0, %c0_1] : memref<1x8x128xf32, #tpu.memory_space<vmem>>, vector<1x8x128xf32>
    %1 = vector.shape_cast %0 : vector<1x8x128xf32> to vector<8x128xf32>
    %c0_2 = arith.constant 0 : index
    %c0_3 = arith.constant 0 : index
    %c0_4 = arith.constant 0 : index
    %2 = vector.load %arg2[%c0_2, %c0_3, %c0_4] : memref<1x8x128xf32, #tpu.memory_space<vmem>>, vector<1x8x128xf32>
    %3 = vector.shape_cast %2 : vector<1x8x128xf32> to vector<8x128xf32>
    %cst = arith.constant dense<0.000000e+00> : vector<8xf32>
    %4 = vector.multi_reduction <add>, %1, %cst [1] : vector<8x128xf32> to vector<8xf32>
    %5 = vector.shape_cast %4 : vector<8xf32> to vector<8x1xf32>
    %cst_5 = arith.constant 3.906250e-03 : f32
    %6 = vector.broadcast %cst_5 : f32 to vector<8x1xf32>
    %7 = arith.mulf %5, %6 : vector<8x1xf32>
    %cst_6 = arith.constant dense<0.000000e+00> : vector<8xf32>
    %8 = vector.multi_reduction <add>, %3, %cst_6 [1] : vector<8x128xf32> to vector<8xf32>
    %9 = vector.shape_cast %8 : vector<8xf32> to vector<8x1xf32>
    %cst_7 = arith.constant 3.906250e-03 : f32
    %10 = vector.broadcast %cst_7 : f32 to vector<8x1xf32>
    %11 = arith.mulf %9, %10 : vector<8x1xf32>
    %c0_8 = arith.constant 0 : index
    %c0_9 = arith.constant 0 : index
    %12 = vector.load %arg3[%c0_8, %c0_9] : memref<8x4xf32, #tpu.memory_space<vmem>>, vector<8x4xf32>
    %c0_10 = arith.constant 0 : index
    %c0_11 = arith.constant 0 : index
    %13 = vector.load %arg4[%c0_10, %c0_11] : memref<8x4xf32, #tpu.memory_space<vmem>>, vector<8x4xf32>
    %c0_12 = arith.constant 0 : index
    %c0_13 = arith.constant 0 : index
    %14 = vector.load %arg5[%c0_12, %c0_13] : memref<1x4xf32, #tpu.memory_space<vmem>>, vector<1x4xf32>
    %c0_14 = arith.constant 0 : index
    %c0_15 = arith.constant 0 : index
    %15 = vector.load %arg6[%c0_14, %c0_15] : memref<8x4xf32, #tpu.memory_space<vmem>>, vector<8x4xf32>
    %c0_16 = arith.constant 0 : index
    %c0_17 = arith.constant 0 : index
    %16 = vector.load %arg7[%c0_16, %c0_17] : memref<8x1xf32, #tpu.memory_space<vmem>>, vector<8x1xf32>
    %17 = vector.broadcast %7 : vector<8x1xf32> to vector<8x4xf32>
    %18 = arith.mulf %12, %17 : vector<8x4xf32>
    %19 = vector.broadcast %11 : vector<8x1xf32> to vector<8x4xf32>
    %20 = arith.mulf %13, %19 : vector<8x4xf32>
    %21 = arith.addf %18, %20 : vector<8x4xf32>
    %cst_18 = arith.constant dense<0.000000e+00> : vector<4xf32>
    %22 = vector.multi_reduction <add>, %21, %cst_18 [0] : vector<8x4xf32> to vector<4xf32>
    %23 = vector.shape_cast %22 : vector<4xf32> to vector<1x4xf32>
    %24 = arith.addf %23, %14 : vector<1x4xf32>
    %cst_19 = arith.constant 0.000000e+00 : f32
    %25 = vector.broadcast %cst_19 : f32 to vector<1x4xf32>
    %26 = arith.maximumf %24, %25 : vector<1x4xf32>
    %27 = vector.broadcast %26 : vector<1x4xf32> to vector<8x4xf32>
    %28 = arith.mulf %15, %27 : vector<8x4xf32>
    %cst_20 = arith.constant dense<0.000000e+00> : vector<8xf32>
    %29 = vector.multi_reduction <add>, %28, %cst_20 [1] : vector<8x4xf32> to vector<8xf32>
    %30 = vector.shape_cast %29 : vector<8xf32> to vector<8x1xf32>
    %31 = arith.addf %30, %16 : vector<8x1xf32>
    %cst_21 = arith.constant 0.000000e+00 : f32
    %32 = vector.broadcast %cst_21 : f32 to vector<8x1xf32>
    %33 = arith.subf %32, %31 : vector<8x1xf32>
    %34 = math.exp %33 : vector<8x1xf32>
    %cst_22 = arith.constant 1.000000e+00 : f32
    %35 = vector.broadcast %cst_22 : f32 to vector<8x1xf32>
    %36 = arith.addf %35, %34 : vector<8x1xf32>
    %cst_23 = arith.constant 1.000000e+00 : f32
    %37 = vector.broadcast %cst_23 : f32 to vector<8x1xf32>
    %38 = arith.divf %37, %36 : vector<8x1xf32>
    %39 = vector.broadcast %38 : vector<8x1xf32> to vector<8x128xf32>
    %40 = arith.mulf %39, %3 : vector<8x128xf32>
    %41 = arith.addf %40, %1 : vector<8x128xf32>
    %c0_24 = arith.constant 0 : index
    %c0_25 = arith.constant 0 : index
    %c0_26 = arith.constant 0 : index
    %42 = vector.load %arg8[%c0_24, %c0_25, %c0_26] : memref<1x8x128xf32, #tpu.memory_space<vmem>>, vector<1x8x128xf32>
    %43 = vector.shape_cast %42 : vector<1x8x128xf32> to vector<8x128xf32>
    %44 = vector.shape_cast %41 : vector<8x128xf32> to vector<1x8x128xf32>
    tpu.vector_store %arg8[%c0_24, %c0_25, %c0_26], %44 {strides = array<i32>} : memref<1x8x128xf32, #tpu.memory_space<vmem>>, vector<1x8x128xf32>,
    return
  }
  func.func @transform_0(%arg0: i32) -> (i32, i32, i32) {
    %c0_i32 = arith.constant 0 : i32
    %c0_i32_0 = arith.constant 0 : i32
    %c0_i32_1 = arith.constant 0 : i32
    return %arg0, %c0_i32, %c0_i32_0 : i32, i32, i32
  }
  func.func @transform_1(%arg0: i32) -> (i32, i32, i32) {
    %c0_i32 = arith.constant 0 : i32
    %c0_i32_0 = arith.constant 0 : i32
    %c0_i32_1 = arith.constant 0 : i32
    return %arg0, %c0_i32, %c0_i32_0 : i32, i32, i32
  }
  func.func @transform_2(%arg0: i32) -> (i32, i32) {
    %c0_i32 = arith.constant 0 : i32
    %c0_i32_0 = arith.constant 0 : i32
    %c0_i32_1 = arith.constant 0 : i32
    return %c0_i32, %c0_i32_0 : i32, i32
  }
  func.func @transform_3(%arg0: i32) -> (i32, i32) {
    %c0_i32 = arith.constant 0 : i32
    %c0_i32_0 = arith.constant 0 : i32
    %c0_i32_1 = arith.constant 0 : i32
    return %c0_i32, %c0_i32_0 : i32, i32
  }
  func.func @transform_4(%arg0: i32) -> (i32, i32) {
    %c0_i32 = arith.constant 0 : i32
    %c0_i32_0 = arith.constant 0 : i32
    %c0_i32_1 = arith.constant 0 : i32
    return %c0_i32, %c0_i32_0 : i32, i32
  }
  func.func @transform_5(%arg0: i32) -> (i32, i32) {
    %c0_i32 = arith.constant 0 : i32
    %c0_i32_0 = arith.constant 0 : i32
    %c0_i32_1 = arith.constant 0 : i32
    return %c0_i32, %c0_i32_0 : i32, i32
  }
  func.func @transform_6(%arg0: i32) -> (i32, i32) {
    %c0_i32 = arith.constant 0 : i32
    %c0_i32_0 = arith.constant 0 : i32
    %c0_i32_1 = arith.constant 0 : i32
    return %c0_i32, %c0_i32_0 : i32, i32
  }
  func.func @transform_7(%arg0: i32) -> (i32, i32, i32) {
    %c0_i32 = arith.constant 0 : i32
    %c0_i32_0 = arith.constant 0 : i32
    %c0_i32_1 = arith.constant 0 : i32
    return %arg0, %c0_i32, %c0_i32_0 : i32, i32, i32
  }
}

</mosaic_0001>

<bundles_post_ra>
// kernel: tpu_custom_call.1
= control target key start
LH: loop header
LB: loop body
LE: loop exit
PB: predicated region body
PF: predicated region fallthrough
CT: control target
= control target key end

     0   :  { %12 = vsyncpa [#allocation3], 0  ;;  %s708_s0 = inlined_call_operand.vmem [shape: f32[2,8,128], index: 0, kind: input, shape index: {}]   ;;  %s709_s1 = inlined_call_operand.vmem [shape: f32[2,8,128], index: 1, kind: input, shape index: {}]   ;;  %s710_s2 = inlined_call_operand.vmem [shape: f32[8,4], index: 2, kind: input, shape index: {}]   ;;  %s711_s3 = inlined_call_operand.vmem [shape: f32[8,4], index: 3, kind: input, shape index: {}]   ;;  %s712_s4 = inlined_call_operand.vmem [shape: f32[1,4], index: 4, kind: input, shape index: {}]   ;;  %s713_s5 = inlined_call_operand.vmem [shape: f32[8,4], index: 5, kind: input, shape index: {}]   ;;  %s714_s6 = inlined_call_operand.vmem [shape: f32[8,1], index: 6, kind: input, shape index: {}]   ;;  %s715_s7 = inlined_call_operand.hbm [shape: f32[2,8,128], index: 7, kind: output, shape index: {}]  }
   0x1   :  { %14 = vsyncpa [#allocation3 + $0x1], 0  ;;  %s588_s24 = smov 0   ;;  %s590_s25 = smov 0  }
   0x2   :  { %s592_s26 = smov 0   ;;  %s594_s27 = smov 0  }
   0x3 LB: > { %s609_s28 = sadd.s32 4294967295, %s544_s27   ;;  %s425_s29 = sadd.s32 4294967294, %s544_s27   ;;  %s544_s27 = sphi %s594_s27, %s721_s27   ;;  %s540_s26 = sphi %s592_s26, %s720_s26   ;;  %s536_s25 = sphi %s590_s25, %s719_s25   ;;  %s532_s24 = sphi %s588_s24, %s718_s24  }
   0x4   : > { %s613_s30 = sadd.s32 1, %s544_s27   ;;  %s184_s8 = sadd.s32 1, %s540_s26 }
   0x5   : > { %s181_s9 = ssub.s32 %s544_s27, %s613_s30  ;;  %p194_p0 = scmp.ne.s32.totalorder %s540_s26, %s536_s25 }
   0x6   : > { %p182_p1 = scmp.eq.s32.totalorder %s181_s9, 0  ;;  %p195_p2 = scmp.eq.s32.totalorder %s609_s28, 1 }
   0x7   : > { %p200_p3 = scmp.ne.s32.totalorder %s536_s25, %s532_s24  ;;  %p201_p4 = scmp.eq.s32.totalorder %s425_s29, 1 }
   0x8   : > { %s624_s10 = scalar_select %p182_p1, %s540_s26, %s184_s8  }
   0x9   : > { %p626_p5 = por %p195_p2, %p194_p0  ;;  %p630_p6 = por %p201_p4, %p200_p3 }
   0xa   : > { %p428_p7 = scmp.ge.s32.totalorder %s544_s27, 1  ;;  %p248_p8 = scmp.lt.s32.totalorder %s544_s27, 3 }
   0xc   : > { %p249_p9 = pnand %p428_p7, %p248_p8 }
   0xd   : > { %p283_p10 = scmp.lt.s32.totalorder (!%p249_p9), %s609_s28, 1  ;;  %v299_v4 = vld [vmem:[%s710_s2] sm:$0xff] (!%p249_p9)  ;;  %vm307_vm0 = vcmask (!%p249_p9), 31744   ;;  %v317_v15 = vlaneseq (!%p249_p9)  ;;  %v546_v28 = vmov (!%p249_p9), 0   ;;  %s433_s19 = sshll.u32 (!%p249_p9), %s609_s28, 7 }
   0xe   : > { %252 = sbr.rel (%p249_p9) target bundleno = 518 (0x206), region = 48  ;;  %v300_v5 = vld [vmem:[%s711_s3] sm:$0xff] (!%p249_p9)  ;;  %476 = vset.pattern.permute.xlu1 (!%p249_p9), %v546_v28  ;;  %477 = vset.pattern.permute.xlu0 (!%p249_p9), %v546_v28  ;;  %s666_s29 = scalar_lea.hbm (!%p249_p9), %s715_s7, %s433_s19 }
   0xf   : > { %v318_v18 = vshrl.u32 (!%p249_p9), %v317_v15, 7  ;;  %v301_v19 = vld [vmem:[%s712_s4] sm:$0x1] (!%p249_p9) }
  0x10   : > { %v302_v24 = vld [vmem:[%s713_s5] sm:$0xff] (!%p249_p9) }
  0x11   : > { %v319_v22 = vsub.s32 (!%p249_p9), 0, %v318_v18  ;;  %v303_v29 = vld [vmem:[%s714_s6] sm:$0xff] (!%p249_p9) }
  0x15   : > { %s284_s13 = scalar_select %p283_p10, %s609_s28, 1 }
  0x16   : > { %s547_s28 = smov [#allocation2]  }
  0x17   : > { %s430_s14 = sshll.u32 %s284_s13, 3  ;;  %s486_s13 = sshll.u32 %s547_s28, 4  ;;  %s487_s13 = int_to_ptr.vmem [resolvable:$false] %s486_s13 }
  0x18   : > { %s286_s17 = scalar_lea.vmem %s708_s0, %s430_s14  ;;  %s290_s20 = scalar_lea.vmem %s709_s1, %s430_s14 }
  0x19   : > { %v291_v0 = vld [vmem:[%s286_s17] sm:$0xff]  ;;  %s280_s17 = sand.u32 1, %s536_s25   ;;  %s488_s14 = scalar_lea.vmem %s487_s13, 256 }
  0x1a   : > { %293 = vadd.xlane.f32.xlu0 %v291_v0  ;;  %v292_v1 = vld [vmem:[%s290_s20] sm:$0xff]  ;;  %s429_s18 = sshll.u32 %s280_s17, 3  ;;  %s341_s8 = scalar_lea.sflag [#allocation3], %s280_s17 }
  0x1b   : > { %s282_s20 = scalar_lea.vmem [#allocation2], %s429_s18 }
  0x1c   : > { %s354_s21 = sshll.u32 %s282_s20, 4  ;;  %s668_s21 = int_to_ptr.vmem [resolvable:$true] %s354_s21 }
  0x1d   : > { %s482_s9 = scalar_lea.vmem %s668_s21, 128  ;;  %p489_p0 = scmp.lt.s32.totalorder %s668_s21, %s487_s13 }
  0x1e   : > { %296 = vadd.xlane.f32.xlu0 %v292_v1  ;;  %p483_p11 = scmp.ne.s32.totalorder %s668_s21, %s482_s9  ;;  %p490_p1 = scmp.lt.s32.totalorder %s488_s14, %s482_s9 }
  0x20   : > { %p484_p12 = pnand %p483_p11, %p626_p5  ;;  %p491_p2 = por %p490_p1, %p489_p0 }
  0x22   : > { %p485_p13 = pneg %p484_p12 }
  0x24   : > { %p492_p3 = pnand %p491_p2, %p485_p13 }
  0xa7   : > { %v294_v2 = vpop.xlane.xlu0 %293 }
  0xa8   : > { %v295_v3 = vmul.f32 0.00390625, %v294_v2 }
  0xaa   : > { %v304_v8 = vmul.f32 %v299_v4, %v295_v3 }
  0xab   : > { %v297_v6 = vpop.xlane.xlu0 %296 }
  0xac   : > { %v298_v7 = vmul.f32 0.00390625, %v297_v6 }
  0xae   : > { %v305_v9 = vmul.f32 %v300_v5, %v298_v7 }
  0xb0   : > { %v306_v10 = vadd.f32 %v305_v9, %v304_v8 }
  0xb2   : > { %v308_v11 = vsel %vm307_vm0, %v306_v10, 0.0 }
  0xb3   : > { %v309_v12 = vrot.slane %v308_v11, 4 }
  0xb5   : > { %v310_v13 = vadd.f32 %v309_v12, %v308_v11 }
  0xb7   : > { %v311_v14 = vrot.slane %v310_v13, 2 }
  0xb9   : > { %v312_v16 = vadd.f32 %v311_v14, %v310_v13 }
  0xbb   : > { %v313_v17 = vrot.slane %v312_v16, 1 }
  0xbd   : > { %v314_v20 = vadd.f32 %v313_v17, %v312_v16 }
  0xbf   : > { %v315_v21 = vadd.f32 %v314_v20, %v301_v19 }
  0xc1   : > { %v316_v23 = vmax.f32 %v315_v21, 0.0 }
  0xc3   : > { %v320_v25 = vrot.slane %v316_v23, %v319_v22 }
  0xc5   : > { %v321_v26 = vmul.f32 %v320_v25, %v302_v24 }
  0xc7   : > { %v322_v27 = vsel %vm307_vm0, %v321_v26, 0.0 }
  0xc8   : > { %323 = vadd.xlane.f32.xlu1 %v322_v27 }
 0x155   : > { %v324_v30 = vpop.xlane.xlu1 %323 }
 0x156   : > { %v325_v31 = vadd.f32 %v324_v30, %v303_v29 }
 0x158   : > { %v326_v32 = vsub.f32 0.0, %v325_v31 }
 0x15a   : > { %v327_v33 = vmul.f32 1.442695, %v326_v32 }
 0x15c   : > { %478 = vpow2.f32 %v327_v33 }
 0x166   : > { %v479_v34 = vpop.eup %478 }
 0x167   : > { %v329_v35 = vadd.f32 1.0, %v479_v34 }
 0x169   : > { %480 = vrcp.f32 %v329_v35 }
 0x173   : > { %v481_v36 = vpop.eup %480 }
 0x174   : > { %334 = vperm.xlu1 %476, %v481_v36  }
 0x1f3   : > { %v335_v37 = vpop.permute.xlu1 %334 }
 0x1f4   : > { %v337_v38 = vmul.f32 %v335_v37, %v292_v1 }
 0x1f6   : > { %v338_v39 = vadd.f32 %v337_v38, %v291_v0 }
 0x1f8   : > { %339 = vst [vmem:[%s282_s20] sm:$0xff] %v338_v39 }
 0x1f9   : > { %495 = shalt.err (!%p492_p3)
}
 0x1fa   : > { %s496_s15 = scalar_lea.hbm %s666_s29, 128  ;;  %s500_s18 = scalar_lea.hbm %s715_s7, 256 }
 0x1fb   : > { %p497_p4 = scmp.ne.s32.totalorder %s666_s29, %s496_s15  ;;  %p501_p9 = scmp.lt.u32.totalorder %s666_s29, %s715_s7 }
 0x1fc   : > { %p502_p10 = scmp.lt.u32.totalorder %s500_s18, %s496_s15  ;;  %p504_p12 = scmp.lt.u32.totalorder %s496_s15, %s666_s29 }
 0x1fd   : > { %p498_p7 = pnand %p497_p4, %p626_p5 }
 0x1fe   : > { %p503_p11 = por %p502_p10, %p501_p9 }
 0x1ff   : > { %p499_p8 = pneg %p498_p7 }
 0x200   : > { %p505_p13 = por %p504_p12, %p503_p11 }
 0x202   : > { %p506_p0 = pnand %p505_p13, %p499_p8 }
 0x204   : > { %509 = shalt.err (!%p506_p0)
}
 0x205   : > { %436 = dma.vmem_to_hbm [thread:$0]  (%p626_p5), %s668_s21, 128, %s666_s29, %s341_s8  }
 0x206 PF: > { %p442_p1 = scmp.ge.s32.totalorder %s544_s27, 2  ;;  %s366_s22 = sand.u32 1, %s532_s24  }
 0x207   : > { %s367_s23 = scalar_lea.sflag [#allocation3], %s366_s22 }
 0x208   : > { %p439_p2 = pnand %p442_p1, %p630_p6 }
 0x20a   : > { %527 = dma.done.wait (!%p439_p2), %s367_s23, 128  }
 0x20b   : > { %529 = vsyncadd (!%p439_p2), %s367_s23, 4294967168  ;;  %p17_p3 = scmp.ge.s32.totalorder %s613_s30, 4   ;;  %s718_s24 = smov %s536_s25 }
 0x20c   : > { %s719_s25 = smov %s540_s26  ;;  %s720_s26 = smov %s624_s10 }
 0x20d   : > { %s721_s27 = smov %s613_s30  ;;  %19 = sbr.rel (!%p17_p3) target bundleno = 3 (0x3), region = 86 }
 0x214   :  { %372 = vsyncpa [#allocation3], 1 }
 0x215   :  { %374 = vsyncpa [#allocation3 + $0x1], 1 }

</bundles_post_ra>
